<compile_context>
chip_gen: v5e
topology: v5e:2x2
jax: 0.10.0
libtpu: 0.0.40
codegen_flags: <defaults>
</compile_context>

<pallas_src>
import math
import functools

import jax
import jax.numpy as jnp
from jax import lax
from jax.experimental import pallas as pl
from jax.experimental.pallas import tpu as pltpu


def _round_up(n, m):
    return ((n + m - 1) // m) * m


def _modulation_linear_kernel(
    x_ref, z_ref, mod_w_ref, mod_b_ref, w_ref, b_ref, out_ref,
    *, eps, negative_slope, act_scale, demodulate, activate, add_bias,
):
    # --- modulation: gamma = z @ mod_w + mod_b -------------------------------
    # mod_w is pre-scaled by 1/sqrt(z_dim) and pre-transposed to [z_pad, in_pad],
    # so the MXU contracts (1,),(0,) natively and in_channel lands on lanes.
    gamma = jnp.dot(
        z_ref[...], mod_w_ref[...], preferred_element_type=jnp.float32
    ) + mod_b_ref[...]                                    # [TM, in_pad]

    x = x_ref[...].astype(jnp.float32) * gamma            # modulate input

    # --- per-sample demodulation (weight demod is pre-baked in the wrapper) ---
    if demodulate:
        x = x * lax.rsqrt(jnp.sum(x * x, axis=1, keepdims=True) + eps)

    # --- main linear: out = x @ w  (w already scaled + demodulated, [K, N]) ---
    out = jnp.dot(x, w_ref[...], preferred_element_type=jnp.float32)

    # --- bias + FusedLeakyReLU (statically selected) ---------------------------
    if add_bias:
        out = out + b_ref[...]
    if activate:
        out = jnp.where(out >= 0.0, out, out * negative_slope) * act_scale

    out_ref[...] = out.astype(out_ref.dtype)


def modulation_linear(x, z, weight, mod_weight, mod_bias, bias=None,
                      *, demodulate=True, activate=True, eps=1e-8,
                      block_rows=512):
    """Pallas forward of ModulationLinear.

    Args:
      x:          [B, in_channel]   input features.
      z:          [B, z_dim]        latent code.
      weight:     [out_channel, in_channel]   main weight.
      mod_weight: [in_channel, z_dim]         EqualLinear modulation weight.
      mod_bias:   [in_channel]                EqualLinear modulation bias (init 1).
      bias:       [out_channel] or None       FusedLeakyReLU bias (activate=True)
                                              or plain output bias (activate=False).
    """
    B, in_channel = x.shape
    out_channel = weight.shape[0]
    z_dim = z.shape[1]

    # Lane-dense padded channel dims (multiples of 128).
    in_pad = _round_up(in_channel, 128)
    out_pad = _round_up(out_channel, 128)
    z_pad = _round_up(z_dim, 128)

    # ---- batch-invariant parameter prep (hoisted out of the per-tile body) ----
    w = weight.astype(jnp.float32) * (1.0 / math.sqrt(in_channel))   # equalized lr
    if demodulate:
        w = w * lax.rsqrt(jnp.sum(w * w, axis=1, keepdims=True) + eps)
    w_t = jnp.pad(w.T, ((0, in_pad - in_channel), (0, out_pad - out_channel)))

    mod_w = mod_weight.astype(jnp.float32) * (1.0 / math.sqrt(z_dim))  # EqualLinear scale
    mod_w_t = jnp.pad(mod_w.T, ((0, z_pad - z_dim), (0, in_pad - in_channel)))
    mod_b = jnp.pad(mod_bias.astype(jnp.float32),
                    (0, in_pad - in_channel)).reshape(1, in_pad)

    add_bias = bias is not None
    b_vec = (jnp.zeros((out_channel,), jnp.float32) if bias is None
             else jnp.ravel(bias).astype(jnp.float32))
    b_p = jnp.pad(b_vec, (0, out_pad - out_channel)).reshape(1, out_pad)

    # ---- batch tiling + VMEM budget (16/32 MiB scoped defaults; 64 MiB on v7x) ----
    tm = _round_up(min(block_rows, _round_up(B, 8)), 8)

    def vmem_est(t):
        acts = 2 * t * (in_pad + z_pad + out_pad) * 4                     # double-buffered tiles
        params = 2 * (z_pad * in_pad + in_pad * out_pad + in_pad + out_pad) * 4
        return acts + params

    while tm > 8 and vmem_est(tm) > (24 << 20):
        tm = _round_up(max(8, tm // 2), 8)
    b_pad = _round_up(B, tm)
    vmem_limit = max(vmem_est(tm) + (4 << 20), 16 << 20)

    x_p = jnp.pad(x.astype(jnp.float32),
                  ((0, b_pad - B), (0, in_pad - in_channel)))
    z_p = jnp.pad(z.astype(jnp.float32),
                  ((0, b_pad - B), (0, z_pad - z_dim)))

    kernel = functools.partial(
        _modulation_linear_kernel,
        eps=eps, negative_slope=0.2, act_scale=2.0 ** 0.5,
        demodulate=demodulate, activate=activate, add_bias=add_bias,
    )

    out = pl.pallas_call(
        kernel,
        out_shape=jax.ShapeDtypeStruct((b_pad, out_pad), jnp.float32),
        grid_spec=pltpu.PrefetchScalarGridSpec(
            num_scalar_prefetch=0,
            grid=(b_pad // tm,),
            in_specs=[
                pl.BlockSpec((tm, in_pad), lambda i: (i, 0)),       # x tile
                pl.BlockSpec((tm, z_pad), lambda i: (i, 0)),        # z tile
                pl.BlockSpec((z_pad, in_pad), lambda i: (0, 0)),    # mod weight (resident)
                pl.BlockSpec((1, in_pad), lambda i: (0, 0)),        # mod bias
                pl.BlockSpec((in_pad, out_pad), lambda i: (0, 0)),  # main weight (resident)
                pl.BlockSpec((1, out_pad), lambda i: (0, 0)),       # output / activation bias
            ],
            out_specs=pl.BlockSpec((tm, out_pad), lambda i: (i, 0)),
        ),
        compiler_params=pltpu.CompilerParams(
            dimension_semantics=("parallel",),   # megacore batch split
            vmem_limit_bytes=vmem_limit,
        ),
    )(x_p, z_p, mod_w_t, mod_b, w_t, b_p)

    return out[:B, :out_channel].astype(x.dtype)


def modulation_linear_ref(x, z, weight, mod_weight, mod_bias, bias=None,
                          *, demodulate=True, activate=True, eps=1e-8):
    """Pure-JAX reference mirroring the PyTorch module."""
    in_channel = x.shape[1]
    z_dim = z.shape[1]
    gamma = z @ (mod_weight * (1.0 / math.sqrt(z_dim))).T + mod_bias
    x = x * gamma
    w = weight * (1.0 / math.sqrt(in_channel))
    if demodulate:
        w = w * lax.rsqrt(jnp.sum(w ** 2, axis=1, keepdims=True) + eps)
        x = x * lax.rsqrt(jnp.sum(x ** 2, axis=1, keepdims=True) + eps)
    out = x @ w.T
    if activate:
        if bias is not None:
            out = out + jnp.ravel(bias)
        out = jnp.where(out >= 0, out, out * 0.2) * (2 ** 0.5)
    elif bias is not None:
        out = out + jnp.ravel(bias)
    return out


if __name__ == "__main__":
    in_channel, out_channel, z_dim = 32, 64, 16

    key = jax.random.PRNGKey(0)
    k_x, k_z, k_w, k_mw, k_x2, k_z2 = jax.random.split(key, 6)

    # Parameters (deterministic init matching the module's __init__ shapes):
    weight = jax.random.normal(k_w, (out_channel, in_channel), dtype=jnp.float32)
    mod_weight = jax.random.normal(k_mw, (in_channel, z_dim), dtype=jnp.float32)  # /lr_mul (=1)
    mod_bias = jnp.ones((in_channel,), dtype=jnp.float32)    # bias_init=1
    act_bias = jnp.zeros((out_channel,), dtype=jnp.float32)  # FusedLeakyReLU bias

    # --- case 1: default config (demodulate=True, activate=True, bias=True) ----
    B1 = 8
    x1 = jax.random.normal(k_x, (B1, in_channel), dtype=jnp.float32)
    z1 = jax.random.normal(k_z, (B1, z_dim), dtype=jnp.float32)
    out1 = jax.block_until_ready(
        modulation_linear(x1, z1, weight, mod_weight, mod_bias, act_bias))
    ref1 = modulation_linear_ref(x1, z1, weight, mod_weight, mod_bias, act_bias)
    assert out1.shape == (B1, out_channel)
    assert jnp.allclose(out1, ref1, atol=1e-4, rtol=1e-4), "case1 mismatch vs JAX reference"

    # --- case 2: larger batch, multi-step pipelined grid (forced small tile) ---
    B2 = 48
    x2 = jax.random.normal(k_x2, (B2, in_channel), dtype=jnp.float32)
    z2 = jax.random.normal(k_z2, (B2, z_dim), dtype=jnp.float32)
    out2 = jax.block_until_ready(
        modulation_linear(x2, z2, weight, mod_weight, mod_bias, act_bias,
                          block_rows=8))  # grid of 6 batch tiles
    ref2 = modulation_linear_ref(x2, z2, weight, mod_weight, mod_bias, act_bias)
    assert out2.shape == (B2, out_channel)
    assert jnp.allclose(out2, ref2, atol=1e-4, rtol=1e-4), "case2 mismatch vs JAX reference"

    # --- case 3: demodulate=False, activate=False, plain output bias ----------
    plain_bias = 0.5 * jnp.ones((out_channel,), dtype=jnp.float32)
    out3 = jax.block_until_ready(
        modulation_linear(x1, z1, weight, mod_weight, mod_bias, plain_bias,
                          demodulate=False, activate=False))
    ref3 = modulation_linear_ref(x1, z1, weight, mod_weight, mod_bias, plain_bias,
                                 demodulate=False, activate=False)
    assert jnp.allclose(out3, ref3, atol=1e-4, rtol=1e-4), "case3 mismatch vs JAX reference"

    # --- case 4: activate=True, bias=False -------------------------------------
    out4 = jax.block_until_ready(
        modulation_linear(x1, z1, weight, mod_weight, mod_bias, None))
    ref4 = modulation_linear_ref(x1, z1, weight, mod_weight, mod_bias, None)
    assert jnp.allclose(out4, ref4, atol=1e-4, rtol=1e-4), "case4 mismatch vs JAX reference"

    print("KERNEL_OK")
</pallas_src>

<mosaic_0001>
module attributes {stable_mosaic.version = 11 : i64} {
  func.func @_modulation_linear_kernel(%arg0: i32, %arg1: memref<8x128xf32, #tpu.memory_space<vmem>>, %arg2: memref<8x128xf32, #tpu.memory_space<vmem>>, %arg3: memref<128x128xf32, #tpu.memory_space<vmem>>, %arg4: memref<1x128xf32, #tpu.memory_space<vmem>>, %arg5: memref<128x128xf32, #tpu.memory_space<vmem>>, %arg6: memref<1x128xf32, #tpu.memory_space<vmem>>, %arg7: memref<8x128xf32, #tpu.memory_space<vmem>>) attributes {dimension_semantics = [#tpu.dimension_semantics<parallel>], iteration_bounds = array<i64: 1>, scalar_prefetch = 0 : i64, scratch_operands = 0 : i64, tpu.core_type = #tpu.core_type<tc>, window_params = [{transform_indices = @transform_0, window_bounds = array<i64: 8, 128>}, {transform_indices = @transform_1, window_bounds = array<i64: 8, 128>}, {pipeline_mode = #tpu.pipeline_mode<synchronous>, transform_indices = @transform_2, window_bounds = array<i64: 128, 128>}, {pipeline_mode = #tpu.pipeline_mode<synchronous>, transform_indices = @transform_3, window_bounds = array<i64: 1, 128>}, {pipeline_mode = #tpu.pipeline_mode<synchronous>, transform_indices = @transform_4, window_bounds = array<i64: 128, 128>}, {pipeline_mode = #tpu.pipeline_mode<synchronous>, transform_indices = @transform_5, window_bounds = array<i64: 1, 128>}, {transform_indices = @transform_6, window_bounds = array<i64: 8, 128>}]} {
    %c0 = arith.constant 0 : index
    %c0_0 = arith.constant 0 : index
    %0 = vector.load %arg2[%c0, %c0_0] : memref<8x128xf32, #tpu.memory_space<vmem>>, vector<8x128xf32>
    %c0_1 = arith.constant 0 : index
    %c0_2 = arith.constant 0 : index
    %1 = vector.load %arg3[%c0_1, %c0_2] : memref<128x128xf32, #tpu.memory_space<vmem>>, vector<128x128xf32>
    %cst = arith.constant dense<0.000000e+00> : vector<8x128xf32>
    %2 = tpu.matmul %0, %1, %cst {dimension_numbers = #tpu.dot_dimension_numbers<[1], [0], [0], [1], [0, 0, 1, 1], [], []>} : vector<8x128xf32>, vector<128x128xf32>, vector<8x128xf32> -> vector<8x128xf32>
    %c0_3 = arith.constant 0 : index
    %c0_4 = arith.constant 0 : index
    %3 = vector.load %arg4[%c0_3, %c0_4] : memref<1x128xf32, #tpu.memory_space<vmem>>, vector<1x128xf32>
    %4 = vector.broadcast %3 : vector<1x128xf32> to vector<8x128xf32>
    %5 = arith.addf %2, %4 : vector<8x128xf32>
    %c0_5 = arith.constant 0 : index
    %c0_6 = arith.constant 0 : index
    %6 = vector.load %arg1[%c0_5, %c0_6] : memref<8x128xf32, #tpu.memory_space<vmem>>, vector<8x128xf32>
    %7 = arith.mulf %6, %5 : vector<8x128xf32>
    %8 = arith.mulf %7, %7 : vector<8x128xf32>
    %cst_7 = arith.constant dense<0.000000e+00> : vector<8xf32>
    %9 = vector.multi_reduction <add>, %8, %cst_7 [1] : vector<8x128xf32> to vector<8xf32>
    %10 = vector.shape_cast %9 : vector<8xf32> to vector<8x1xf32>
    %cst_8 = arith.constant 9.99999993E-9 : f32
    %11 = vector.broadcast %cst_8 : f32 to vector<8x1xf32>
    %12 = arith.addf %10, %11 : vector<8x1xf32>
    %13 = math.rsqrt %12 : vector<8x1xf32>
    %14 = vector.broadcast %13 : vector<8x1xf32> to vector<8x128xf32>
    %15 = arith.mulf %7, %14 : vector<8x128xf32>
    %c0_9 = arith.constant 0 : index
    %c0_10 = arith.constant 0 : index
    %16 = vector.load %arg5[%c0_9, %c0_10] : memref<128x128xf32, #tpu.memory_space<vmem>>, vector<128x128xf32>
    %cst_11 = arith.constant dense<0.000000e+00> : vector<8x128xf32>
    %17 = tpu.matmul %15, %16, %cst_11 {dimension_numbers = #tpu.dot_dimension_numbers<[1], [0], [0], [1], [0, 0, 1, 1], [], []>} : vector<8x128xf32>, vector<128x128xf32>, vector<8x128xf32> -> vector<8x128xf32>
    %c0_12 = arith.constant 0 : index
    %c0_13 = arith.constant 0 : index
    %18 = vector.load %arg6[%c0_12, %c0_13] : memref<1x128xf32, #tpu.memory_space<vmem>>, vector<1x128xf32>
    %19 = vector.broadcast %18 : vector<1x128xf32> to vector<8x128xf32>
    %20 = arith.addf %17, %19 : vector<8x128xf32>
    %cst_14 = arith.constant 0.000000e+00 : f32
    %21 = vector.broadcast %cst_14 : f32 to vector<8x128xf32>
    %22 = arith.cmpf oge, %20, %21 : vector<8x128xf32>
    %cst_15 = arith.constant 2.000000e-01 : f32
    %23 = vector.broadcast %cst_15 : f32 to vector<8x128xf32>
    %24 = arith.mulf %20, %23 : vector<8x128xf32>
    %25 = arith.select %22, %20, %24 : vector<8x128xi1>, vector<8x128xf32>
    %cst_16 = arith.constant 1.41421354 : f32
    %26 = vector.broadcast %cst_16 : f32 to vector<8x128xf32>
    %27 = arith.mulf %25, %26 : vector<8x128xf32>
    %c0_17 = arith.constant 0 : index
    %c0_18 = arith.constant 0 : index
    %28 = vector.load %arg7[%c0_17, %c0_18] : memref<8x128xf32, #tpu.memory_space<vmem>>, vector<8x128xf32>
    tpu.vector_store %arg7[%c0_17, %c0_18], %27 {strides = array<i32>} : memref<8x128xf32, #tpu.memory_space<vmem>>, vector<8x128xf32>,
    return
  }
  func.func @transform_0(%arg0: i32) -> (i32, i32) {
    %c0_i32 = arith.constant 0 : i32
    %c0_i32_0 = arith.constant 0 : i32
    return %arg0, %c0_i32 : i32, i32
  }
  func.func @transform_1(%arg0: i32) -> (i32, i32) {
    %c0_i32 = arith.constant 0 : i32
    %c0_i32_0 = arith.constant 0 : i32
    return %arg0, %c0_i32 : i32, i32
  }
  func.func @transform_2(%arg0: i32) -> (i32, i32) {
    %c0_i32 = arith.constant 0 : i32
    %c0_i32_0 = arith.constant 0 : i32
    %c0_i32_1 = arith.constant 0 : i32
    return %c0_i32, %c0_i32_0 : i32, i32
  }
  func.func @transform_3(%arg0: i32) -> (i32, i32) {
    %c0_i32 = arith.constant 0 : i32
    %c0_i32_0 = arith.constant 0 : i32
    %c0_i32_1 = arith.constant 0 : i32
    return %c0_i32, %c0_i32_0 : i32, i32
  }
  func.func @transform_4(%arg0: i32) -> (i32, i32) {
    %c0_i32 = arith.constant 0 : i32
    %c0_i32_0 = arith.constant 0 : i32
    %c0_i32_1 = arith.constant 0 : i32
    return %c0_i32, %c0_i32_0 : i32, i32
  }
  func.func @transform_5(%arg0: i32) -> (i32, i32) {
    %c0_i32 = arith.constant 0 : i32
    %c0_i32_0 = arith.constant 0 : i32
    %c0_i32_1 = arith.constant 0 : i32
    return %c0_i32, %c0_i32_0 : i32, i32
  }
  func.func @transform_6(%arg0: i32) -> (i32, i32) {
    %c0_i32 = arith.constant 0 : i32
    %c0_i32_0 = arith.constant 0 : i32
    return %arg0, %c0_i32 : i32, i32
  }
}

</mosaic_0001>

<bundles_post_ra>
// kernel: tpu_custom_call.1
= control target key start
LH: loop header
LB: loop body
LE: loop exit
PB: predicated region body
PF: predicated region fallthrough
CT: control target
= control target key end

     0   :  { %11 = vsyncpa [#allocation3], 0  ;;  %s407_s0 = inlined_call_operand.hbm [shape: f32[8,128], index: 0, kind: input, shape index: {}]   ;;  %s408_s1 = inlined_call_operand.hbm [shape: f32[8,128], index: 1, kind: input, shape index: {}]   ;;  %s409_s2 = inlined_call_operand.hbm [shape: f32[128,128], index: 2, kind: input, shape index: {}]   ;;  %s410_s3 = inlined_call_operand.vmem [shape: f32[1,128], index: 3, kind: input, shape index: {}]   ;;  %s411_s4 = inlined_call_operand.hbm [shape: f32[128,128], index: 4, kind: input, shape index: {}]   ;;  %s412_s5 = inlined_call_operand.vmem [shape: f32[1,128], index: 5, kind: input, shape index: {}]   ;;  %s413_s6 = inlined_call_operand.hbm [shape: f32[8,128], index: 6, kind: output, shape index: {}]  }
   0x1   :  { %12 = vsyncpa [#allocation6], 0 }
   0x2   :  { %13 = vsyncpa [#allocation9], 0  ;;  %s31_s23 = sshll.u32 %s408_s1, 4  ;;  %s32_s23 = int_to_ptr.hbm [resolvable:$true] %s31_s23 }
   0x3   :  { %14 = vsyncpa [#allocation4], 0  ;;  %s344_s24 = smov [#allocation5]   ;;  %s20_s28 = sshll.u32 %s407_s0, 4  ;;  %s21_s28 = int_to_ptr.hbm [resolvable:$true] %s20_s28 }
   0x4   :  { %s33_s25 = sshll.u32 %s344_s24, 4  ;;  %s345_s29 = smov [#allocation2]   ;;  %s34_s25 = int_to_ptr.vmem [resolvable:$true] %s33_s25 }
   0x5   :  { %36 = dma.hbm_to_vmem [thread:$0]  %s32_s23, 128, %s34_s25, [#allocation6]  }
   0x6   :  { %s22_s30 = sshll.u32 %s345_s29, 4  ;;  %s41_s9 = sshll.u32 %s409_s2, 4  ;;  %s23_s30 = int_to_ptr.vmem [resolvable:$true] %s22_s30  ;;  %s42_s9 = int_to_ptr.hbm [resolvable:$true] %s41_s9 }
   0x7   :  { %25 = dma.hbm_to_vmem [thread:$0]  %s21_s28, 128, %s23_s30, [#allocation3]  }
   0x8   :  { %s346_s1 = smov [#allocation7]   ;;  %s56_s13 = sshll.u32 %s411_s4, 4  ;;  %s57_s13 = int_to_ptr.hbm [resolvable:$true] %s56_s13 }
   0x9   :  { %s43_s10 = sshll.u32 %s346_s1, 4  ;;  %s347_s14 = smov 128   ;;  %s44_s10 = int_to_ptr.vmem [resolvable:$true] %s43_s10 }
   0xa   :  { %s348_s0 = smov 8   ;;  %s349_s15 = smov [#allocation8]  }
   0xb   :  { %49 = dma.hbm_to_vmem [thread:$0]  %s42_s9, 2048, %s44_s10, [#allocation6], %s347_s14, %s347_s14, %s348_s0  }
   0xc   :  { %s58_s16 = sshll.u32 %s349_s15, 4  ;;  %s59_s16 = int_to_ptr.vmem [resolvable:$true] %s58_s16 }
   0xd   :  { %64 = dma.hbm_to_vmem [thread:$0]  %s57_s13, 2048, %s59_s16, [#allocation9], %s347_s14, %s347_s14, %s348_s0  }
   0xe   :  { %336 = dma.done.wait [#allocation3], 128  }
   0xf   :  { %337 = vsyncadd [#allocation3], 4294967168 }
  0x10   :  { %338 = dma.done.wait [#allocation6], 2176  }
  0x11   :  { %339 = vsyncadd [#allocation6], 4294965120 }
  0x12   :  { %340 = dma.done.wait [#allocation9], 2048  }
  0x13   :  { %341 = vsyncadd [#allocation9], 4294965248  ;;  %v99_v0 = vld [vmem:[#allocation7 + $0x78] sm:$0xff]  ;;  %v98_v1 = vld [vmem:[#allocation7 + $0x70] sm:$0xff]  ;;  %s350_s18 = smov [#allocation10]   ;;  %s193_s22 = sshll.u32 %s413_s6, 4  ;;  %s194_s22 = int_to_ptr.hbm [resolvable:$true] %s193_s22 }
  0x14   :  { %104 = vmatpush.msra.mxu0 %v99_v0  ;;  %v97_v2 = vld [vmem:[#allocation7 + $0x68] sm:$0xff]  ;;  %v96_v3 = vld [vmem:[#allocation7 + $0x60] sm:$0xff]  ;;  %v95_v4 = vld [vmem:[#allocation7 + $0x58] sm:$0xff]  ;;  %s191_s19 = sshll.u32 %s350_s18, 4  ;;  %s192_s19 = int_to_ptr.vmem [resolvable:$true] %s191_s19 }
  0x15   :  { %v94_v5 = vld [vmem:[#allocation7 + $0x50] sm:$0xff]  ;;  %v93_v6 = vld [vmem:[#allocation7 + $0x48] sm:$0xff]  ;;  %v92_v7 = vld [vmem:[#allocation7 + $0x40] sm:$0xff] }
  0x16   :  { %105 = vmatpush.msra.mxu0 %v98_v1  ;;  %v91_v8 = vld [vmem:[#allocation7 + $0x38] sm:$0xff]  ;;  %v90_v9 = vld [vmem:[#allocation7 + $0x30] sm:$0xff]  ;;  %v89_v10 = vld [vmem:[#allocation7 + $0x28] sm:$0xff] }
  0x17   :  { %v88_v11 = vld [vmem:[#allocation7 + $0x20] sm:$0xff]  ;;  %v87_v12 = vld [vmem:[#allocation7 + $0x18] sm:$0xff]  ;;  %v86_v13 = vld [vmem:[#allocation7 + $0x10] sm:$0xff] }
  0x18   :  { %106 = vmatpush.msra.mxu0 %v97_v2  ;;  %v85_v14 = vld [vmem:[#allocation7 + $0x8] sm:$0xff]  ;;  %v84_v15 = vld [vmem:[#allocation7] sm:$0xff]  ;;  %v83_v16 = vld [vmem:[#allocation5] sm:$0xff] }
  0x19   :  { %v156_v17 = vld [vmem:[#allocation8 + $0x78] sm:$0xff]  ;;  %v155_v18 = vld [vmem:[#allocation8 + $0x70] sm:$0xff]  ;;  %v154_v19 = vld [vmem:[#allocation8 + $0x68] sm:$0xff] }
  0x1a   :  { %107 = vmatpush.msra.mxu0 %v96_v3  ;;  %161 = vmatpush.msra.mxu1 %v156_v17  ;;  %v153_v20 = vld [vmem:[#allocation8 + $0x60] sm:$0xff]  ;;  %v212_v21 = vld [vmem:[%s410_s3] ss:$0 sm:$0xff]  ;;  %v152_v27 = vld [vmem:[#allocation8 + $0x58] sm:$0xff] }
  0x1b   :  { %v124_v23 = vld [vmem:[#allocation2] sm:$0xff]  ;;  %v150_v29 = vld [vmem:[#allocation8 + $0x48] sm:$0xff]  ;;  %v149_v30 = vld [vmem:[#allocation8 + $0x40] sm:$0xff] }
  0x1c   :  { %108 = vmatpush.msra.mxu0 %v95_v4  ;;  %162 = vmatpush.msra.mxu1 %v155_v18  ;;  %v151_v28 = vld [vmem:[#allocation8 + $0x50] sm:$0xff]  ;;  %v148_v31 = vld [vmem:[#allocation8 + $0x38] sm:$0xff]  ;;  %v146_v33 = vld [vmem:[#allocation8 + $0x28] sm:$0xff] }
  0x1d   :  { %v147_v32 = vld [vmem:[#allocation8 + $0x30] sm:$0xff]  ;;  %v145_v34 = vld [vmem:[#allocation8 + $0x20] sm:$0xff]  ;;  %v144_v35 = vld [vmem:[#allocation8 + $0x18] sm:$0xff] }
  0x1e   :  { %109 = vmatpush.msra.mxu0 %v94_v5  ;;  %163 = vmatpush.msra.mxu1 %v154_v19  ;;  %v143_v36 = vld [vmem:[#allocation8 + $0x10] sm:$0xff]  ;;  %v142_v37 = vld [vmem:[#allocation8 + $0x8] sm:$0xff]  ;;  %v141_v38 = vld [vmem:[#allocation8] sm:$0xff] }
  0x1f   :  { %v213_v49 = vld [vmem:[%s412_s5] ss:$0 sm:$0xff] }
  0x20   :  { %110 = vmatpush.msra.mxu0 %v93_v6  ;;  %164 = vmatpush.msra.mxu1 %v153_v20 }
  0x22   :  { %111 = vmatpush.msra.mxu0 %v92_v7  ;;  %165 = vmatpush.msra.mxu1 %v152_v27 }
  0x24   :  { %112 = vmatpush.msra.mxu0 %v91_v8  ;;  %166 = vmatpush.msra.mxu1 %v151_v28 }
  0x26   :  { %113 = vmatpush.msra.mxu0 %v90_v9  ;;  %167 = vmatpush.msra.mxu1 %v150_v29 }
  0x28   :  { %114 = vmatpush.msra.mxu0 %v89_v10  ;;  %168 = vmatpush.msra.mxu1 %v149_v30 }
  0x2a   :  { %115 = vmatpush.msra.mxu0 %v88_v11  ;;  %169 = vmatpush.msra.mxu1 %v148_v31 }
  0x2c   :  { %116 = vmatpush.msra.mxu0 %v87_v12  ;;  %170 = vmatpush.msra.mxu1 %v147_v32 }
  0x2e   :  { %117 = vmatpush.msra.mxu0 %v86_v13  ;;  %171 = vmatpush.msra.mxu1 %v146_v33 }
  0x30   :  { %118 = vmatpush.msra.mxu0 %v85_v14  ;;  %172 = vmatpush.msra.mxu1 %v145_v34 }
  0x32   :  { %119 = vmatpush.msra.mxu0 %v84_v15  ;;  %173 = vmatpush.msra.mxu1 %v144_v35 }
  0x33   :  { %120 = vmatmul.f32.vlgmr.msra.gmra.mxu0 %v83_v16 }
  0x34   :  { %174 = vmatpush.msra.mxu1 %v143_v36 }
  0x36   :  { %175 = vmatpush.msra.mxu1 %v142_v37 }
  0x38   :  { %176 = vmatpush.msra.mxu1 %v141_v38 }
  0xb0   :  { %v121_v22 = vpop.f32.mrf.mxu0 }
  0xb1   :  { %v122_v24 = vadd.f32 %v212_v21, %v121_v22 }
  0xb3   :  { %v125_v25 = vmul.f32 %v124_v23, %v122_v24 }
  0xb5   :  { %v126_v26 = vmul.f32 %v125_v25, %v125_v25 }
  0xb7   :  { %127 = vadd.xlane.f32.xlu0 %v126_v26 }
 0x12a   :  { %v128_v39 = vpop.xlane.xlu0 %127 }
 0x12b   :  { %v129_v40 = vadd.f32 1e-08, %v128_v39 }
 0x12d   :  { %214 = vrsqrt.f32 %v129_v40  ;;  %vm136_vm1 = vweird.f32 %v129_v40 }
 0x133   :  { %v215_v41 = vpop.eup %214 }
 0x134   :  { %v131_v42 = vmul.f32 %v215_v41, %v129_v40  ;;  %vm137_vm0 = vweird.f32 %v215_v41 }
 0x135   :  { %vm138_vm2 = vmor %vm136_vm1, %vm137_vm0 }
 0x136   :  { %v132_v43 = vmul.f32 %v215_v41, %v131_v42 }
 0x138   :  { %v133_v44 = vmul.f32 0.5, %v132_v43 }
 0x13a   :  { %v134_v45 = vsub.f32 1.5, %v133_v44 }
 0x13c   :  { %v135_v46 = vmul.f32 %v215_v41, %v134_v45 }
 0x13e   :  { %v139_v47 = vsel %vm138_vm2, %v215_v41, %v135_v46 }
 0x13f   :  { %v140_v48 = vmul.f32 %v139_v47, %v125_v25 }
 0x141   :  { %177 = vmatmul.f32.vlgmr.msra.gmra.mxu1 %v140_v48 }
 0x1be   :  { %v178_v50 = vpop.f32.mrf.mxu1 }
 0x1bf   :  { %v179_v51 = vadd.f32 %v213_v49, %v178_v50 }
 0x1c1   :  { %vm181_vm3 = vcmp.ge.f32.partialorder %v179_v51, 0.0  ;;  %v182_v52 = vmul.f32 0.2, %v179_v51 }
 0x1c3   :  { %v183_v53 = vsel %vm181_vm3, %v179_v51, %v182_v52 }
 0x1c4   :  { %v184_v54 = vmul.f32 1.4142135, %v183_v53 }
 0x1c6   :  { %185 = vst [vmem:[#allocation10] sm:$0xff] %v184_v54 }
 0x1c7   :  { %196 = dma.vmem_to_hbm [thread:$0]  %s192_s19, 128, %s194_s22, [#allocation4]  }
 0x1c8   :  { %342 = dma.done.wait [#allocation4], 128  }
 0x1c9   :  { %343 = vsyncadd [#allocation4], 4294967168 }
 0x1ca   :  { %201 = vsyncpa [#allocation3], 1 }
 0x1cb   :  { %202 = vsyncpa [#allocation6], 1 }
 0x1cc   :  { %203 = vsyncpa [#allocation9], 1 }
 0x1cd   :  { %204 = vsyncpa [#allocation4], 1 }

</bundles_post_ra>
